<compile_context>
chip_gen: v6e
topology: v6e:2x2x1
jax: 0.10.0
libtpu: 0.0.40
codegen_flags: <defaults>
</compile_context>

<pallas_src>
import functools
import math

import numpy as np

import jax
import jax.numpy as jnp
from jax import lax
from jax.experimental import pallas as pl
from jax.experimental.pallas import tpu as pltpu


def weights_map_np(size=(16, 16)):
    """Deterministic weight map, identical math to the PyTorch helper."""
    V = np.zeros(size, dtype=np.float64)
    x = np.append(np.arange(0, 8), np.arange(7, -1, -1))
    for i in range(size[0]):
        for j in range(size[1]):
            V[i][j] = math.log(math.e + math.sqrt(x[i] ** 2 + x[j] ** 2))
    return V.astype(np.float32)


def _round_up(v, m):
    return -(-v // m) * m


def _l_cen_kernel(x_ref, pwt_ref, pleft_ref, wm_ref, o_ref, *,
                  mean_val, bt, b, c, h2, w2, needs_mask):
    """One grid step = up to `bt` batch elements; writes one partial-sum block."""
    pwt = pwt_ref[...]       # (w2, 16)   bf16: column pooling (+ lane fold)
    pleft = pleft_ref[...]   # (16, c*h2) f32 : channel mean + row pooling
    wm = wm_ref[...]         # (16, 16)   f32 : weights_map

    if needs_mask:
        base = pl.program_id(0) * bt

    acc = jnp.zeros((16, 16), jnp.float32)
    for i in range(bt):                     # static, fully unrolled loop
        # (c, h2, w2) -> (c*h2, w2): leading-dim merge (h2 % 8 == 0 -> free).
        xf = x_ref[i].reshape(c * h2, w2).astype(jnp.bfloat16)
        # Column pooling on the MXU: single-pass bf16, f32 accumulation.
        r = jnp.dot(xf, pwt, preferred_element_type=jnp.float32)        # (c*h2, 16)
        # Channel mean + row pooling: tiny matmul, pinned f32 precision.
        pooled = jnp.dot(pleft, r, preferred_element_type=jnp.float32,
                         precision=lax.Precision.HIGHEST)               # (16, 16)
        diff = (pooled - mean_val) * wm
        sq = diff * diff
        if needs_mask:
            # Tail tile: padded (garbage) batch rows are selected away here.
            sq = jnp.where(base + i < b, sq, 0.0)
        acc = acc + sq

    # Single cross-lane reduction per tile; lane-dense, unmasked store.
    o_ref[...] = jnp.broadcast_to(jnp.sum(acc), o_ref.shape).astype(o_ref.dtype)


def l_cen_pallas(x, patch_size, mean_val):
    b, c, h, w = x.shape
    assert h == 16 * patch_size and w == 16 * patch_size, (
        "pooled map must be 16x16 to broadcast against weights_map((16,16))")

    # --- lane-density fold: make the last dim 128-wide when it is exact -----
    fold = 1
    if w < 128 and 128 % w == 0:
        f = 128 // w
        if h % f == 0 and patch_size % f == 0:
            fold = f
    h2, w2 = h // fold, w * fold
    x2 = x.reshape(b, c, h2, w2)            # free row-major view
    patch2 = patch_size // fold             # folded rows per pooled row

    itemsize = jnp.dtype(x.dtype).itemsize
    bytes_per_batch = int(c * h * w * itemsize)
    # TODO(synk): add a channel/row tile grid axis (with cross-step
    # accumulation) if a single batch element exceeds the VMEM block budget.
    assert bytes_per_batch <= (8 << 20), "single-batch block exceeds VMEM budget"

    # --- batch-tile size ------------------------------------------------------
    # Target ~4 MiB x-blocks, but keep at least min(b, 4) grid steps so the
    # parallel axis can shard across v7x's two TCs and the pipeline overlaps.
    target_block_bytes = 4 << 20
    bt_by_bytes = max(1, target_block_bytes // bytes_per_batch)
    min_tiles = min(b, 4)
    bt_by_tiles = -(-b // min_tiles)
    bt = int(max(1, min(bt_by_bytes, bt_by_tiles, 64, b)))
    num_tiles = pl.cdiv(b, bt)
    needs_mask = (b % bt) != 0

    # --- pooling matrices -----------------------------------------------------
    # Column pooling (w2, 16): 1/patch entries; the lane fold is absorbed here
    # (all `fold` row-segments of a folded row pool into the same output col).
    pwt = np.zeros((w2, 16), dtype=np.float32)
    for f in range(fold):
        for j in range(16):
            s = f * w + j * patch_size
            pwt[s:s + patch_size, j] = 1.0 / patch_size
    # Row pooling + channel mean (16, c*h2): 1/(c*patch) entries.
    pleft = np.zeros((16, c * h2), dtype=np.float32)
    for ch in range(c):
        for i in range(16):
            s = ch * h2 + i * patch2
            pleft[i, s:s + patch2] = 1.0 / (c * patch_size)
    wmap = weights_map_np((16, 16))

    # --- VMEM budget from the actual block sizes ------------------------------
    x_blk = bt * c * _round_up(h2, 8) * _round_up(w2, 128) * itemsize
    const_blk = (_round_up(w2, 16) * 128 * 2          # pwt (bf16)
                 + 16 * _round_up(c * h2, 128) * 4    # pleft (f32)
                 + 16 * 128 * 4)                      # wm
    out_blk = 8 * 128 * 4
    interm = _round_up(c * h2, 8) * (128 * 4 + _round_up(w2, 128) * 2)
    vmem_needed = 2 * (x_blk + const_blk + out_blk) + interm + (2 << 20)
    vmem_limit = int(min(48 << 20, max(vmem_needed, 16 << 20)))

    # NOTE: mean_val is baked in as a compile-time constant (one compile per
    # distinct mean_val, matching the fixed constructor arg of the nn.Module).
    kernel = functools.partial(
        _l_cen_kernel, mean_val=float(mean_val), bt=bt, b=b, c=c, h2=h2, w2=w2,
        needs_mask=needs_mask)

    # TODO(synk): pipeline_mode=pl.Buffered(1) (or a one-shot scratch DMA) on
    # the constant operands would free their second buffer on v7x's 64 MiB VMEM.
    partials = pl.pallas_call(
        kernel,
        out_shape=jax.ShapeDtypeStruct((num_tiles, 8, 128), jnp.float32),
        grid_spec=pltpu.PrefetchScalarGridSpec(
            num_scalar_prefetch=0,
            grid=(num_tiles,),
            in_specs=[
                pl.BlockSpec((bt, c, h2, w2), lambda i: (i, 0, 0, 0)),
                pl.BlockSpec((w2, 16), lambda i: (0, 0)),
                pl.BlockSpec((16, c * h2), lambda i: (0, 0)),
                pl.BlockSpec((16, 16), lambda i: (0, 0)),
            ],
            out_specs=pl.BlockSpec((1, 8, 128), lambda i: (i, 0, 0)),
        ),
        compiler_params=pltpu.CompilerParams(
            dimension_semantics=("parallel",),
            vmem_limit_bytes=vmem_limit,
        ),
    )(x2, jnp.asarray(pwt, dtype=jnp.bfloat16), jnp.asarray(pleft),
      jnp.asarray(wmap))

    # Final cross-tile reduction + mean normalization in plain JAX.
    return jnp.sum(partials[:, 0, 0]) / float(b * 16 * 16)


def l_cen_reference(x, patch_size, mean_val):
    """Pure-JAX reference for sanity checking."""
    b, c, h, w = x.shape
    xm = jnp.mean(x, axis=1, keepdims=True)  # (b, 1, h, w)
    pooled = xm.reshape(b, 1, 16, patch_size, 16, patch_size).mean(axis=(3, 5))
    wmap = jnp.asarray(weights_map_np((16, 16)))
    return jnp.mean(((pooled - mean_val) * wmap) ** 2)


if __name__ == "__main__":
    # Config 1: patch_size=4 -> 64x64 input; exercises the lane fold (w2=128).
    b1, c1, p1 = 2, 4, 4
    x1 = jax.random.uniform(jax.random.PRNGKey(0),
                            (b1, c1, 16 * p1, 16 * p1), dtype=jnp.float32)
    out1 = jax.block_until_ready(l_cen_pallas(x1, p1, 0.6))
    ref1 = jax.block_until_ready(l_cen_reference(x1, p1, 0.6))
    assert jnp.allclose(out1, ref1, rtol=5e-3, atol=1e-6), (out1, ref1)

    # Config 2: awkward batch (b=5 -> bt=2, masked tail tile), no lane fold.
    b2, c2, p2 = 5, 2, 1
    x2 = jax.random.uniform(jax.random.PRNGKey(1),
                            (b2, c2, 16 * p2, 16 * p2), dtype=jnp.float32)
    out2 = jax.block_until_ready(l_cen_pallas(x2, p2, 0.6))
    ref2 = jax.block_until_ready(l_cen_reference(x2, p2, 0.6))
    assert jnp.allclose(out2, ref2, rtol=5e-3, atol=1e-6), (out2, ref2)

    print("KERNEL_OK")
</pallas_src>

<mosaic_0001>
module attributes {stable_mosaic.version = 11 : i64} {
  func.func @_l_cen_kernel(%arg0: i32, %arg1: memref<1x4x32x128xf32, #tpu.memory_space<vmem>>, %arg2: memref<128x16xbf16, #tpu.memory_space<vmem>>, %arg3: memref<16x128xf32, #tpu.memory_space<vmem>>, %arg4: memref<16x16xf32, #tpu.memory_space<vmem>>, %arg5: memref<1x8x128xf32, #tpu.memory_space<vmem>>) attributes {dimension_semantics = [#tpu.dimension_semantics<parallel>], iteration_bounds = array<i64: 2>, scalar_prefetch = 0 : i64, scratch_operands = 0 : i64, tpu.core_type = #tpu.core_type<tc>, window_params = [{transform_indices = @transform_0, window_bounds = array<i64: 1, 4, 32, 128>}, {pipeline_mode = #tpu.pipeline_mode<synchronous>, transform_indices = @transform_1, window_bounds = array<i64: 128, 16>}, {pipeline_mode = #tpu.pipeline_mode<synchronous>, transform_indices = @transform_2, window_bounds = array<i64: 16, 128>}, {pipeline_mode = #tpu.pipeline_mode<synchronous>, transform_indices = @transform_3, window_bounds = array<i64: 16, 16>}, {transform_indices = @transform_4, window_bounds = array<i64: 1, 8, 128>}]} {
    %c0 = arith.constant 0 : index
    %c0_0 = arith.constant 0 : index
    %0 = vector.load %arg2[%c0, %c0_0] : memref<128x16xbf16, #tpu.memory_space<vmem>>, vector<128x16xbf16>
    %c0_1 = arith.constant 0 : index
    %c0_2 = arith.constant 0 : index
    %1 = vector.load %arg3[%c0_1, %c0_2] : memref<16x128xf32, #tpu.memory_space<vmem>>, vector<16x128xf32>
    %c0_3 = arith.constant 0 : index
    %c0_4 = arith.constant 0 : index
    %2 = vector.load %arg4[%c0_3, %c0_4] : memref<16x16xf32, #tpu.memory_space<vmem>>, vector<16x16xf32>
    %cst = arith.constant 0.000000e+00 : f32
    %3 = vector.broadcast %cst : f32 to vector<16x16xf32>
    %c0_5 = arith.constant 0 : index
    %c0_6 = arith.constant 0 : index
    %c0_7 = arith.constant 0 : index
    %c0_8 = arith.constant 0 : index
    %4 = vector.load %arg1[%c0_5, %c0_6, %c0_7, %c0_8] : memref<1x4x32x128xf32, #tpu.memory_space<vmem>>, vector<1x4x32x128xf32>
    %5 = vector.shape_cast %4 : vector<1x4x32x128xf32> to vector<4x32x128xf32>
    %6 = vector.shape_cast %5 : vector<4x32x128xf32> to vector<128x128xf32>
    %7 = arith.truncf %6 : vector<128x128xf32> to vector<128x128xbf16>
    %cst_9 = arith.constant dense<0.000000e+00> : vector<128x16xf32>
    %8 = tpu.matmul %7, %0, %cst_9 {dimension_numbers = #tpu.dot_dimension_numbers<[1], [0], [0], [1], [0, 0, 1, 1], [], []>} : vector<128x128xbf16>, vector<128x16xbf16>, vector<128x16xf32> -> vector<128x16xf32>
    %cst_10 = arith.constant dense<0.000000e+00> : vector<16x16xf32>
    %9 = tpu.matmul %1, %8, %cst_10 {dimension_numbers = #tpu.dot_dimension_numbers<[1], [0], [0], [1], [0, 0, 1, 1], [], []>, precision = #tpu.contract_precision<fp32>} : vector<16x128xf32>, vector<128x16xf32>, vector<16x16xf32> -> vector<16x16xf32>
    %cst_11 = arith.constant 6.000000e-01 : f32
    %10 = vector.broadcast %cst_11 : f32 to vector<16x16xf32>
    %11 = arith.subf %9, %10 : vector<16x16xf32>
    %12 = arith.mulf %11, %2 : vector<16x16xf32>
    %13 = arith.mulf %12, %12 : vector<16x16xf32>
    %14 = arith.addf %3, %13 : vector<16x16xf32>
    %15 = vector.shape_cast %14 : vector<16x16xf32> to vector<1x16x16xf32>
    %cst_12 = arith.constant dense<0.000000e+00> : vector<1xf32>
    %16 = vector.multi_reduction <add>, %15, %cst_12 [1, 2] : vector<1x16x16xf32> to vector<1xf32>
    %17 = vector.shape_cast %16 : vector<1xf32> to vector<1x1x1xf32>
    %18 = vector.extract %17[0, 0, 0] : f32 from vector<1x1x1xf32>
    %19 = vector.broadcast %18 : f32 to vector<1x8x128xf32>
    %c0_13 = arith.constant 0 : index
    %c0_14 = arith.constant 0 : index
    %c0_15 = arith.constant 0 : index
    %20 = vector.load %arg5[%c0_13, %c0_14, %c0_15] : memref<1x8x128xf32, #tpu.memory_space<vmem>>, vector<1x8x128xf32>
    tpu.vector_store %arg5[%c0_13, %c0_14, %c0_15], %19 {strides = array<i32>} : memref<1x8x128xf32, #tpu.memory_space<vmem>>, vector<1x8x128xf32>,
    return
  }
  func.func @transform_0(%arg0: i32) -> (i32, i32, i32, i32) {
    %c0_i32 = arith.constant 0 : i32
    %c0_i32_0 = arith.constant 0 : i32
    %c0_i32_1 = arith.constant 0 : i32
    %c0_i32_2 = arith.constant 0 : i32
    return %arg0, %c0_i32, %c0_i32_0, %c0_i32_1 : i32, i32, i32, i32
  }
  func.func @transform_1(%arg0: i32) -> (i32, i32) {
    %c0_i32 = arith.constant 0 : i32
    %c0_i32_0 = arith.constant 0 : i32
    %c0_i32_1 = arith.constant 0 : i32
    return %c0_i32, %c0_i32_0 : i32, i32
  }
  func.func @transform_2(%arg0: i32) -> (i32, i32) {
    %c0_i32 = arith.constant 0 : i32
    %c0_i32_0 = arith.constant 0 : i32
    %c0_i32_1 = arith.constant 0 : i32
    return %c0_i32, %c0_i32_0 : i32, i32
  }
  func.func @transform_3(%arg0: i32) -> (i32, i32) {
    %c0_i32 = arith.constant 0 : i32
    %c0_i32_0 = arith.constant 0 : i32
    %c0_i32_1 = arith.constant 0 : i32
    return %c0_i32, %c0_i32_0 : i32, i32
  }
  func.func @transform_4(%arg0: i32) -> (i32, i32, i32) {
    %c0_i32 = arith.constant 0 : i32
    %c0_i32_0 = arith.constant 0 : i32
    %c0_i32_1 = arith.constant 0 : i32
    return %arg0, %c0_i32, %c0_i32_0 : i32, i32, i32
  }
}

</mosaic_0001>

<bundles_post_ra>
// kernel: tpu_custom_call.1
= control target key start
LH: loop header
LB: loop body
LE: loop exit
PB: predicated region body
PF: predicated region fallthrough
CT: control target
= control target key end

     0   :  { %9 = vsyncpa [#allocation3], 0  ;;  %s2343_s0 = inlined_call_operand.hbm [shape: f32[2,4,32,128], index: 0, kind: input, shape index: {}]   ;;  %s2344_s1 = inlined_call_operand.vmem [shape: bf16[128,16], index: 1, kind: input, shape index: {}]   ;;  %s2345_s2 = inlined_call_operand.vmem [shape: f32[16,128], index: 2, kind: input, shape index: {}]   ;;  %s2346_s3 = inlined_call_operand.vmem [shape: f32[16,16], index: 3, kind: input, shape index: {}]   ;;  %s2347_s4 = inlined_call_operand.hbm [shape: f32[2,8,128], index: 4, kind: output, shape index: {}]  }
   0x1   :  { %11 = vsyncpa [#allocation3 + $0x1], 0 }
   0x2   :  { %12 = vsyncpa [#allocation4], 0 }
   0x3   :  { %14 = vsyncpa [#allocation4 + $0x1], 0  ;;  %s1768_s15 = smov 0   ;;  %s1770_s16 = smov 0  }
   0x4   :  { %s1772_s17 = smov 0   ;;  %s1774_s18 = smov 0  }
   0x5 LB: > { %s1789_s19 = sadd.s32 4294967295, %s1737_s18   ;;  %s1197_s20 = sadd.s32 4294967294, %s1737_s18   ;;  %s1737_s18 = sphi %s1774_s18, %s2362_s18   ;;  %s1733_s17 = sphi %s1772_s17, %s2361_s17   ;;  %s1729_s16 = sphi %s1770_s16, %s2360_s16   ;;  %s1725_s15 = sphi %s1768_s15, %s2359_s15  }
   0x6   : > { %s1793_s21 = sadd.s32 1, %s1737_s18   ;;  %s27_s22 = sadd.s32 1, %s1733_s17 }
   0x7   : > { %s24_s23 = ssub.s32 %s1737_s18, %s1793_s21  ;;  %p34_p0 = scmp.ne.s32.totalorder %s1733_s17, %s1729_s16 }
   0x8   : > { %p25_p1 = scmp.eq.s32.totalorder %s24_s23, 0  ;;  %p35_p2 = scmp.eq.s32.totalorder %s1737_s18, 0 }
   0x9   : > { %p40_p3 = scmp.ne.s32.totalorder %s1729_s16, %s1725_s15  ;;  %p41_p4 = scmp.eq.s32.totalorder %s1789_s19, 0 }
   0xa   : > { %s1805_s24 = scalar_select %p25_p1, %s1733_s17, %s27_s22  }
   0xb   : > { %p1807_p5 = por %p35_p2, %p34_p0  ;;  %p1811_p6 = por %p41_p4, %p40_p3 }
   0xc   : > { %p127_p7 = scmp.eq.s32.totalorder %s1789_s19, 1  ;;  %p133_p8 = scmp.eq.s32.totalorder %s1197_s20, 1 }
   0xd   : > { %s2351_s26 = scalar_select %p1811_p6, 1, 0 }
   0xe   : > { %p1601_p10 = scmp.lt.s32.totalorder %s1737_s18, 2  ;;  %p1818_p11 = por %p127_p7, %p34_p0 }
   0xf   : > { %p1822_p12 = por %p133_p8, %p40_p3  ;;  %s162_s29 = sand.u32 1, %s1733_s17  }
  0x10   : > { %s2352_s27 = scalar_select %p1818_p11, 1, 0 }
  0x11   : > { %s2353_s28 = scalar_select %p1822_p12, 1, 0 }
  0x12   : > { %s1220_s30 = sshll.u32 %s1737_s18, 11  ;;  %s1200_s5 = sshll.u32 %s162_s29, 7 }
  0x13   : > { %s1831_s8 = scalar_lea.hbm %s2343_s0, %s1220_s30  ;;  %s166_s9 = scalar_lea.vmem [#allocation2], %s1200_s5 }
  0x14   : > { %s173_s10 = sshll.u32 %s166_s9, 4  ;;  %p1835_p13 = pnand %p1601_p10, %p1807_p5  ;;  %s1839_s10 = int_to_ptr.vmem [resolvable:$true] %s173_s10 }
  0x15   : > { %s1841_s12 = scalar_lea.sflag [#allocation3], %s162_s29  ;;  %s1645_s13 = scalar_lea.hbm %s1831_s8, 2048 }
  0x16   : > { %p1646_p0 = scmp.ne.s32.totalorder %s1831_s8, %s1645_s13  ;;  %p1647_p1 = pneg %p1835_p13 }
  0x17   : > { %s1650_s22 = scalar_lea.hbm %s2343_s0, 4096  ;;  %p1651_p4 = scmp.lt.s32.totalorder %s1831_s8, %s2343_s0 }
  0x18   : > { %p1648_p2 = pnand %p1647_p1, %p1646_p0  ;;  %p1652_p5 = scmp.lt.s32.totalorder %s1650_s22, %s1645_s13 }
  0x1a   : > { %p1649_p3 = pneg %p1648_p2  ;;  %p1653_p7 = por %p1652_p5, %p1651_p4 }
  0x1c   : > { %p1654_p8 = pnand %p1653_p7, %p1649_p3 }
  0x1e   : > { %1657 = shalt.err (!%p1654_p8)
}
  0x1f   : > { %s1658_s29 = scalar_lea.vmem %s1839_s10, 2048  ;;  %s1739_s30 = smov [#allocation2]  }
  0x20   : > { %p1659_p10 = scmp.ne.s32.totalorder %s1839_s10, %s1658_s29  ;;  %s1663_s5 = sshll.u32 %s1739_s30, 4  ;;  %s1664_s5 = int_to_ptr.vmem [resolvable:$false] %s1663_s5 }
  0x21   : > { %s1665_s6 = scalar_lea.vmem %s1664_s5, 4096  ;;  %p1666_p2 = scmp.lt.s32.totalorder %s1839_s10, %s1664_s5 }
  0x22   : > { %p1661_p9 = pnand %p1659_p10, %p1647_p1  ;;  %p1667_p12 = scmp.lt.s32.totalorder %s1665_s6, %s1658_s29 }
  0x24   : > { %p1662_p0 = pneg %p1661_p9  ;;  %p1668_p11 = por %p1667_p12, %p1666_p2 }
  0x26   : > { %p1669_p6 = pnand %p1668_p11, %p1662_p0 }
  0x28   : > { %1672 = shalt.err (!%p1669_p6)
}
  0x29   : > { %s1740_s7 = smov 128   ;;  %s1741_s9 = smov 8  }
  0x2a   : > { %1596 = dma.hbm_to_vmem [thread:$0]  (!%p1835_p13), %s1831_s8, 2048, %s1839_s10, %s1841_s12, %s1740_s7, %s1740_s7, %s1741_s9  }
  0x2b   : > { %p1203_p9 = scmp.ge.s32.totalorder %s1737_s18, 1  ;;  %p181_p1 = scmp.lt.s32.totalorder %s1737_s18, 3 }
  0x2d   : > { %p182_p3 = pnand %p1203_p9, %p181_p1 }
  0x2e   : > { %s1865_s13 = sand.u32 (!%p182_p3), 1, %s1729_s16   ;;  %p2355_p6 = scmp.ne.s32.totalorder (!%p182_p3), %s2351_s26, 0 }
  0x2f   : > { %185 = sbr.rel (%p182_p3) target bundleno = 837 (0x345), region = 36  ;;  %s1204_s14 = sshll.u32 (!%p182_p3), %s1865_s13, 7 }
  0x30   : > { %s188_s20 = scalar_lea.sflag (!%p182_p3), [#allocation3], %s1865_s13  ;;  %s1869_s22 = scalar_lea.vmem (!%p182_p3), [#allocation2], %s1204_s14 }
  0x34   : > { %1716 = dma.done.wait (%p2355_p6), %s188_s20, 2048  }
  0x35   : > { %1718 = vsyncadd (%p2355_p6), %s188_s20, 4294965248  ;;  %v1637_v0 = vld [vmem:[%s2344_s1 + $0x38] sm:$0xff]   ;;  %v1638_v1 = vld [vmem:[%s2344_s1 + $0x30] sm:$0xff]   ;;  %vm1098_vm0 = vcmask 130048   ;;  %s1205_s30 = sshll.u32 %s1865_s13, 3  ;;  %s1217_s7 = sshll.u32 %s1789_s19, 7 }
  0x36   : > { %1345 = vmatprep.subr.bf16.mxu0 %v1637_v0  ;;  %v1639_v2 = vld [vmem:[%s2344_s1 + $0x28] sm:$0xff]   ;;  %v1640_v3 = vld [vmem:[%s2344_s1 + $0x20] sm:$0xff]   ;;  %v1641_v7 = vld [vmem:[%s2344_s1 + $0x18] sm:$0xff]   ;;  %s215_s5 = scalar_lea.vmem [#allocation5], %s1205_s30  ;;  %s1125_s8 = scalar_lea.hbm %s2347_s4, %s1217_s7 }
  0x37   : > { %1346 = vmatpush3.bf16.msra.mxu0 %v1637_v0  ;;  %v237_v4 = vld [vmem:[%s1869_s22] sm:$0xff]  ;;  %v238_v5 = vld [vmem:[%s1869_s22 + $0x8] sm:$0xff]  ;;  %v1642_v8 = vld [vmem:[%s2344_s1 + $0x10] sm:$0xff]   ;;  %s1127_s6 = sshll.u32 %s215_s5, 4  ;;  %s1114_s10 = scalar_lea.sflag [#allocation4], %s1865_s13  ;;  %s2303_s6 = int_to_ptr.vmem [resolvable:$true] %s1127_s6 }
  0x38   : > { %1347 = vmatprep.subr.bf16.mxu0 %v1638_v1  ;;  %v253_v6 = vpack.c.bf16 %v238_v5, %v237_v4  ;;  %v1643_v9 = vld [vmem:[%s2344_s1 + $0x8] sm:$0xff]   ;;  %v1644_v10 = vld [vmem:[%s2344_s1] sm:$0xff]   ;;  %v239_v11 = vld [vmem:[%s1869_s22 + $0x10] sm:$0xff]  ;;  %s1673_s11 = scalar_lea.vmem %s2303_s6, 128  ;;  %p2356_p12 = scmp.ne.s32.totalorder %s2352_s27, 0 }
  0x39   : > { %v240_v12 = vld [vmem:[%s1869_s22 + $0x18] sm:$0xff]  ;;  %v241_v13 = vld [vmem:[%s1869_s22 + $0x20] sm:$0xff]  ;;  %v242_v14 = vld [vmem:[%s1869_s22 + $0x28] sm:$0xff]  ;;  %p1674_p11 = scmp.ne.s32.totalorder %s2303_s6, %s1673_s11 }
  0x3a   : > { %1361 = vmatprep.mubr.bf16.mxu0 %v253_v6  ;;  %v254_v15 = vpack.c.bf16 %v240_v12, %v239_v11  ;;  %v255_v16 = vpack.c.bf16 %v242_v14, %v241_v13  ;;  %v243_v17 = vld [vmem:[%s1869_s22 + $0x30] sm:$0xff]  ;;  %v244_v18 = vld [vmem:[%s1869_s22 + $0x38] sm:$0xff]  ;;  %v245_v19 = vld [vmem:[%s1869_s22 + $0x40] sm:$0xff] }
  0x3b   : > { %1348 = vmatpush3.bf16.msra.mxu0 %v1638_v1  ;;  %v246_v20 = vld [vmem:[%s1869_s22 + $0x48] sm:$0xff]  ;;  %v256_v21 = vpack.c.bf16 %v244_v18, %v243_v17  ;;  %v247_v23 = vld [vmem:[%s1869_s22 + $0x50] sm:$0xff]  ;;  %v248_v24 = vld [vmem:[%s1869_s22 + $0x58] sm:$0xff]  ;;  %p1675_p13 = pnand %p1674_p11, %p2356_p12 }
  0x3c   : > { %1349 = vmatprep.subr.bf16.mxu0 %v1639_v2  ;;  %v257_v22 = vpack.c.bf16 %v246_v20, %v245_v19  ;;  %v249_v25 = vld [vmem:[%s1869_s22 + $0x60] sm:$0xff]  ;;  %v250_v26 = vld [vmem:[%s1869_s22 + $0x68] sm:$0xff]  ;;  %v258_v27 = vpack.c.bf16 %v248_v24, %v247_v23  ;;  %v251_v29 = vld [vmem:[%s1869_s22 + $0x70] sm:$0xff] }
  0x3d   : > { %v259_v28 = vpack.c.bf16 %v250_v26, %v249_v25  ;;  %v252_v30 = vld [vmem:[%s1869_s22 + $0x78] sm:$0xff]  ;;  %v233_v32 = vld [vmem:[%s2345_s2] sm:$0xff]  ;;  %v234_v25 = vld [vmem:[%s2345_s2 + $0x8] sm:$0xff]  ;;  %p1676_p4 = pneg %p1675_p13  ;;  %s1742_s22 = smov [#allocation5]  }
  0x3e   : > { %v260_v31 = vpack.c.bf16 %v252_v30, %v251_v29  ;;  %v1918_v33 = vand.u32 4294901760, %v233_v32  ;;  %s1677_s19 = sshll.u32 %s1742_s22, 4  ;;  %s1678_s19 = int_to_ptr.vmem [resolvable:$false] %s1677_s19 }
  0x3f   : > { %1350 = vmatpush3.bf16.msra.mxu0 %v1639_v2  ;;  %s1679_s12 = scalar_lea.vmem %s1678_s19, 256  ;;  %p1680_p5 = scmp.lt.s32.totalorder %s2303_s6, %s1678_s19 }
  0x40   : > { %1351 = vmatprep.subr.bf16.mxu0 %v1640_v3  ;;  %v1921_v34 = vsub.f32 %v233_v32, %v1918_v33  ;;  %v2052_v32 = vand.u32 4294901760, %v234_v25  ;;  %p1681_p7 = scmp.lt.s32.totalorder %s1679_s12, %s1673_s11 }
  0x42   : > { %v489_v35 = vand.u32 4294901760, %v1921_v34  ;;  %p1682_p8 = por %p1681_p7, %p1680_p5 }
  0x43   : > { %1352 = vmatpush3.bf16.msra.mxu0 %v1640_v3 }
  0x44   : > { %1353 = vmatprep.subr.bf16.mxu0 %v1641_v7  ;;  %v490_v36 = vsub.f32 %v1921_v34, %v489_v35  ;;  %p1683_p10 = pnand %p1682_p8, %p1676_p4 }
  0x46   : > { %v491_v37 = vand.u32 4294901760, %v490_v36 }
  0x47   : > { %1354 = vmatpush3.bf16.msra.mxu0 %v1641_v7 }
  0x48   : > { %1355 = vmatprep.subr.bf16.mxu0 %v1642_v8  ;;  %1409 = vmatprep.mubr.f32.mxu1 %v491_v37 }
  0x4b   : > { %1356 = vmatpush3.bf16.msra.mxu0 %v1642_v8 }
  0x4c   : > { %1357 = vmatprep.subr.bf16.mxu0 %v1643_v9 }
  0x4f   : > { %1358 = vmatpush3.bf16.msra.mxu0 %v1643_v9 }
  0x50   : > { %1359 = vmatprep.subr.bf16.mxu0 %v1644_v10 }
  0x53   : > { %1360 = vmatpush3.bf16.msra.mxu0 %v1644_v10 }
  0x56   : > { %1362 = vmatmul.mubr.bf16.vlgmr.msra.gmra.mxu0 %v254_v15 }
  0x57   : > { %1365 = vmatprep.mubr.bf16.mxu0 %v255_v16 }
  0x5e   : > { %1366 = vmatmul.mubr.bf16.gmra.mxu0 %v256_v21 }
  0x5f   : > { %1369 = vmatprep.mubr.bf16.mxu0 %v257_v22 }
  0x66   : > { %1370 = vmatmul.mubr.bf16.gmra.mxu0 %v258_v27 }
  0x67   : > { %1373 = vmatprep.mubr.bf16.mxu0 %v259_v28 }
  0x6e   : > { %1374 = vmatmul.mubr.bf16.gmra.mxu0 %v260_v31 }
  0x6f   : > { %1444 = vmatprep.mubr.f32.mxu0 %v1918_v33 }
 0x116   : > { %v1928_v38 = vpop.f32.mrf.mxu0 }
 0x118   : > { %v1930_v39 = vpop.f32.mrf.mxu0 }
 0x11a   : > { %v1932_v40 = vpop.f32.mrf.mxu0 }
 0x11b   : > { %v2049_v31 = vand.u32 4294901760, %v1932_v40 }
 0x11c   : > { %v1934_v41 = vpop.f32.mrf.mxu0 }
 0x11e   : > { %v1367_v42 = vpop.f32.mrf.mxu0 }
 0x11f   : > { %v2007_v15 = vand.u32 4294901760, %v1367_v42 }
 0x120   : > { %v1936_v43 = vpop.f32.mrf.mxu0 }
 0x121   : > { %v2036_v26 = vsub.f32 %v1367_v42, %v2007_v15  ;;  %v2040_v27 = vand.u32 4294901760, %v1936_v43 }
 0x122   : > { %v1368_v44 = vpop.f32.mrf.mxu0 }
 0x123   : > { %v1995_v10 = vand.u32 4294901760, %v1368_v44 }
 0x124   : > { %v1938_v45 = vpop.f32.mrf.mxu0 }
 0x125   : > { %v2020_v20 = vsub.f32 %v1368_v44, %v1995_v10  ;;  %v2024_v21 = vand.u32 4294901760, %v1938_v45 }
 0x126   : > { %v1371_v46 = vpop.f32.mrf.mxu0 }
 0x127   : > { %v1951_v58 = vand.u32 4294901760, %v1371_v46  ;;  %v2056_v36 = vsub.f32 %v1938_v45, %v2024_v21  ;;  %v2062_v44 = vand.u32 4294901760, %v2020_v20  ;;  %v2070_v45 = vsub.f32 %v1936_v43, %v2040_v27 }
 0x128   : > { %v375_v47 = vpop.f32.mrf.mxu0  ;;  %v2084_v43 = vsub.f32 %v234_v25, %v2052_v32 }
 0x129   : > { %v1979_v4 = vsub.f32 %v1371_v46, %v1951_v58  ;;  %v1981_v5 = vand.u32 4294901760, %v375_v47  ;;  %v2065_v46 = vand.u32 4294901760, %v1928_v38 }
 0x12a   : > { %v1372_v48 = vpop.f32.mrf.mxu0 }
 0x12b   : > { %v1947_v56 = vand.u32 4294901760, %v1372_v48  ;;  %v2011_v16 = vsub.f32 %v375_v47, %v1981_v5  ;;  %v2017_v19 = vand.u32 4294901760, %v1979_v4 }
 0x12c   : > { %v378_v49 = vpop.f32.mrf.mxu0 }
 0x12d   : > { %v1967_v0 = vsub.f32 %v1372_v48, %v1947_v56  ;;  %v1969_v1 = vand.u32 4294901760, %v378_v49  ;;  %v546_v29 = vsub.f32 %v1979_v4, %v2017_v19  ;;  %v2046_v30 = vand.u32 4294901760, %v2011_v16 }
 0x12e   : > { %v1375_v50 = vpop.f32.mrf.mxu0 }
 0x12f   : > { %v1940_v51 = vand.u32 4294901760, %v1375_v50  ;;  %v1999_v11 = vsub.f32 %v378_v49, %v1969_v1  ;;  %v2005_v14 = vand.u32 4294901760, %v1967_v0  ;;  %v547_v47 = vand.u32 4294901760, %v546_v29 }
 0x130   : > { %v391_v52 = vpop.f32.mrf.mxu0  ;;  %v560_v48 = vsub.f32 %v2011_v16, %v2046_v30  ;;  %v2076_v49 = vand.u32 4294901760, %v2036_v26 }
 0x131   : > { %v1943_v53 = vsub.f32 %v1375_v50, %v1940_v51  ;;  %v1945_v54 = vand.u32 4294901760, %v391_v52  ;;  %v539_v23 = vsub.f32 %v1967_v0, %v2005_v14  ;;  %v2030_v24 = vand.u32 4294901760, %v1999_v11 }
 0x132   : > { %v1376_v55 = vpop.f32.mrf.mxu0  ;;  %v2080_v50 = vsub.f32 %v1932_v40, %v2049_v31  ;;  %v2097_v40 = vsub.f32 %v1928_v38, %v2065_v46  ;;  %v499_v38 = vand.u32 4294901760, %v2084_v43 }
 0x133   : > { %v1949_v57 = vand.u32 4294901760, %v1376_v55  ;;  %v1954_v60 = vsub.f32 %v391_v52, %v1945_v54  ;;  %v1963_v63 = vand.u32 4294901760, %v1943_v53  ;;  %v540_v37 = vand.u32 4294901760, %v539_v23 }
 0x134   : > { %v394_v59 = vpop.f32.mrf.mxu0  ;;  %v553_v42 = vsub.f32 %v1999_v11, %v2030_v24  ;;  %v2087_v52 = vand.u32 4294901760, %v1934_v41  ;;  %v2119_v25 = vand.u32 4294901760, %v2080_v50 }
 0x135   : > { %v1957_v61 = vsub.f32 %v1376_v55, %v1949_v57  ;;  %v1959_v62 = vand.u32 4294901760, %v394_v59  ;;  %1377 = vmatprep.subr.mxu1 %v1949_v57  ;;  %v518_v7 = vsub.f32 %v1943_v53, %v1963_v63  ;;  %v1993_v9 = vand.u32 4294901760, %v1954_v60 }
 0x136   : > { %1378 = vmatpush3.msra.mxu1 %v1949_v57  ;;  %v554_v55 = vand.u32 4294901760, %v553_v42  ;;  %v500_v42 = vsub.f32 %v2084_v43, %v499_v38 }
 0x137   : > { %v1972_v2 = vsub.f32 %v394_v59, %v1959_v62  ;;  %1379 = vmatprep.subr.mxu1 %v1940_v51  ;;  %v1976_v3 = vand.u32 4294901760, %v1957_v61  ;;  %v519_v17 = vand.u32 4294901760, %v518_v7  ;;  %v532_v18 = vsub.f32 %v1954_v60, %v1993_v9 }
 0x138   : > { %1380 = vmatpush3.msra.mxu1 %v1940_v51  ;;  %v567_v59 = vsub.f32 %v2020_v20, %v2062_v44  ;;  %v2101_v7 = vand.u32 4294901760, %v1930_v39 }
 0x139   : > { %1381 = vmatprep.subr.mxu1 %v1959_v62  ;;  %v511_v6 = vsub.f32 %v1957_v61, %v1976_v3  ;;  %v1990_v8 = vand.u32 4294901760, %v1972_v2  ;;  %v533_v28 = vand.u32 4294901760, %v532_v18  ;;  %v2113_v18 = vsub.f32 %v1934_v41, %v2087_v52 }
 0x13a   : > { %1382 = vmatpush3.msra.mxu1 %v1959_v62 }
 0x13b   : > { %1383 = vmatprep.subr.mxu1 %v1945_v54  ;;  %v512_v12 = vand.u32 4294901760, %v511_v6  ;;  %v525_v13 = vsub.f32 %v1972_v2, %v1990_v8  ;;  %v2093_v6 = vand.u32 4294901760, %v2056_v36 }
 0x13c   : > { %1384 = vmatpush3.msra.mxu1 %v1945_v54 }
 0x13d   : > { %1385 = vmatprep.subr.mxu1 %v1947_v56  ;;  %1412 = vmatprep.subr.mxu0 %v512_v12  ;;  %v526_v22 = vand.u32 4294901760, %v525_v13  ;;  %v574_v13 = vsub.f32 %v2036_v26, %v2076_v49  ;;  %v581_v23 = vsub.f32 %v2056_v36, %v2093_v6 }
 0x13e   : > { %1386 = vmatpush3.msra.mxu1 %v1947_v56  ;;  %1413 = vmatpush3.msra.mxu0 %v512_v12  ;;  %v561_v12 = vand.u32 4294901760, %v560_v48  ;;  %v2140_v48 = vand.u32 4294901760, %v2113_v18 }
 0x13f   : > { %1387 = vmatprep.subr.mxu1 %v1951_v58  ;;  %1414 = vmatprep.subr.mxu0 %v519_v17  ;;  %v575_v41 = vand.u32 4294901760, %v574_v13  ;;  %v501_v13 = vand.u32 4294901760, %v500_v42 }
 0x140   : > { %1388 = vmatpush3.msra.mxu1 %v1951_v58  ;;  %1415 = vmatpush3.msra.mxu0 %v519_v17  ;;  %v2107_v17 = vand.u32 4294901760, %v2070_v45 }
 0x141   : > { %1389 = vmatprep.subr.mxu1 %v1969_v1  ;;  %1416 = vmatprep.subr.mxu0 %v526_v22 }
 0x142   : > { %1390 = vmatpush3.msra.mxu1 %v1969_v1  ;;  %1417 = vmatpush3.msra.mxu0 %v526_v22  ;;  %v568_v22 = vand.u32 4294901760, %v567_v59  ;;  %v588_v29 = vsub.f32 %v2070_v45, %v2107_v17 }
 0x143   : > { %1391 = vmatprep.subr.mxu1 %v1981_v5  ;;  %1418 = vmatprep.subr.mxu0 %v533_v28 }
 0x144   : > { %1392 = vmatpush3.msra.mxu1 %v1981_v5  ;;  %1419 = vmatpush3.msra.mxu0 %v533_v28  ;;  %v2124_v28 = vsub.f32 %v1930_v39, %v2101_v7  ;;  %v582_v39 = vand.u32 4294901760, %v581_v23  ;;  %v609_v23 = vsub.f32 %v2113_v18, %v2140_v48 }
 0x145   : > { %1393 = vmatprep.subr.mxu1 %v1995_v10  ;;  %1420 = vmatprep.subr.mxu0 %v540_v37 }
 0x146   : > { %1394 = vmatpush3.msra.mxu1 %v1995_v10  ;;  %1421 = vmatpush3.msra.mxu0 %v540_v37  ;;  %v2130_v37 = vand.u32 4294901760, %v2097_v40  ;;  %v610_v42 = vand.u32 4294901760, %v609_v23 }
 0x147   : > { %1395 = vmatprep.subr.mxu1 %v2007_v15  ;;  %1422 = vmatprep.subr.mxu0 %v547_v47 }
 0x148   : > { %1396 = vmatpush3.msra.mxu1 %v2007_v15  ;;  %1423 = vmatpush3.msra.mxu0 %v547_v47  ;;  %v595_v47 = vsub.f32 %v2080_v50, %v2119_v25  ;;  %v602_v59 = vsub.f32 %v2097_v40, %v2130_v37 }
 0x149   : > { %1397 = vmatprep.subr.mxu1 %v2024_v21  ;;  %1424 = vmatprep.subr.mxu0 %v554_v55 }
 0x14a   : > { %1398 = vmatpush3.msra.mxu1 %v2024_v21  ;;  %1425 = vmatpush3.msra.mxu0 %v554_v55  ;;  %v589_v55 = vand.u32 4294901760, %v588_v29 }
 0x14b   : > { %1399 = vmatprep.subr.mxu1 %v2040_v27  ;;  %1426 = vmatprep.subr.mxu0 %v561_v12 }
 0x14c   : > { %1400 = vmatpush3.msra.mxu1 %v2040_v27  ;;  %1427 = vmatpush3.msra.mxu0 %v561_v12  ;;  %v2147_v12 = vand.u32 4294901760, %v2124_v28 }
 0x14d   : > { %1401 = vmatprep.subr.mxu1 %v2049_v31  ;;  %1428 = vmatprep.subr.mxu0 %v568_v22 }
 0x14e   : > { %1402 = vmatpush3.msra.mxu1 %v2049_v31  ;;  %1429 = vmatpush3.msra.mxu0 %v568_v22  ;;  %v596_v22 = vand.u32 4294901760, %v595_v47  ;;  %v616_v29 = vsub.f32 %v2124_v28, %v2147_v12 }
 0x14f   : > { %1403 = vmatprep.subr.mxu1 %v2065_v46  ;;  %1430 = vmatprep.subr.mxu0 %v575_v41 }
 0x150   : > { %1404 = vmatpush3.msra.mxu1 %v2065_v46  ;;  %1431 = vmatpush3.msra.mxu0 %v575_v41  ;;  %v603_v41 = vand.u32 4294901760, %v602_v59 }
 0x151   : > { %1405 = vmatprep.subr.mxu1 %v2087_v52  ;;  %1432 = vmatprep.subr.mxu0 %v582_v39 }
 0x152   : > { %1406 = vmatpush3.msra.mxu1 %v2087_v52  ;;  %1433 = vmatpush3.msra.mxu0 %v582_v39  ;;  %v617_v39 = vand.u32 4294901760, %v616_v29 }
 0x153   : > { %1407 = vmatprep.subr.mxu1 %v2101_v7  ;;  %1434 = vmatprep.subr.mxu0 %v589_v55 }
 0x154   : > { %1408 = vmatpush3.msra.mxu1 %v2101_v7  ;;  %1435 = vmatpush3.msra.mxu0 %v589_v55 }
 0x155   : > { %1436 = vmatprep.subr.mxu0 %v596_v22  ;;  %1447 = vmatprep.subr.mxu1 %v1957_v61 }
 0x156   : > { %1410 = vmatmul.mubr.f32.vlgmr.msra.gmra.mxu1 %v501_v13  ;;  %1437 = vmatpush3.msra.mxu0 %v596_v22 }
 0x157   : > { %1448 = vmatpush3.msra.mxu1 %v1957_v61  ;;  %1438 = vmatprep.subr.mxu0 %v603_v41 }
 0x158   : > { %1449 = vmatprep.subr.mxu1 %v1943_v53  ;;  %1439 = vmatpush3.msra.mxu0 %v603_v41 }
 0x159   : > { %1450 = vmatpush3.msra.mxu1 %v1943_v53  ;;  %1440 = vmatprep.subr.mxu0 %v610_v42 }
 0x15a   : > { %1451 = vmatprep.subr.mxu1 %v1972_v2  ;;  %1441 = vmatpush3.msra.mxu0 %v610_v42 }
 0x15b   : > { %1452 = vmatpush3.msra.mxu1 %v1972_v2  ;;  %1442 = vmatprep.subr.mxu0 %v617_v39 }
 0x15c   : > { %1453 = vmatprep.subr.mxu1 %v1954_v60  ;;  %1443 = vmatpush3.msra.mxu0 %v617_v39 }
 0x15d   : > { %1454 = vmatpush3.msra.mxu1 %v1954_v60  ;;  %1445 = vmatmul.mubr.f32.vlgmr.msra.gmra.mxu0 %v2052_v32 }
 0x15e   : > { %1455 = vmatprep.subr.mxu1 %v1967_v0  ;;  %1482 = vmatprep.subr.mxu0 %v1949_v57 }
 0x15f   : > { %1456 = vmatpush3.msra.mxu1 %v1967_v0  ;;  %1483 = vmatpush3.msra.mxu0 %v1949_v57 }
 0x160   : > { %1457 = vmatprep.subr.mxu1 %v1979_v4  ;;  %1484 = vmatprep.subr.mxu0 %v1940_v51 }
 0x161   : > { %1458 = vmatpush3.msra.mxu1 %v1979_v4  ;;  %1485 = vmatpush3.msra.mxu0 %v1940_v51 }
 0x162   : > { %1459 = vmatprep.subr.mxu1 %v1999_v11  ;;  %1486 = vmatprep.subr.mxu0 %v1959_v62 }
 0x163   : > { %1460 = vmatpush3.msra.mxu1 %v1999_v11  ;;  %1487 = vmatpush3.msra.mxu0 %v1959_v62 }
 0x164   : > { %1461 = vmatprep.subr.mxu1 %v2011_v16  ;;  %1488 = vmatprep.subr.mxu0 %v1945_v54 }
 0x165   : > { %1462 = vmatpush3.msra.mxu1 %v2011_v16  ;;  %1489 = vmatpush3.msra.mxu0 %v1945_v54 }
 0x166   : > { %1463 = vmatprep.subr.mxu1 %v2020_v20  ;;  %1490 = vmatprep.subr.mxu0 %v1947_v56 }
 0x167   : > { %1464 = vmatpush3.msra.mxu1 %v2020_v20  ;;  %1491 = vmatpush3.msra.mxu0 %v1947_v56 }
 0x168   : > { %1465 = vmatprep.subr.mxu1 %v2036_v26  ;;  %1492 = vmatprep.subr.mxu0 %v1951_v58 }
 0x169   : > { %1466 = vmatpush3.msra.mxu1 %v2036_v26  ;;  %1493 = vmatpush3.msra.mxu0 %v1951_v58 }
 0x16a   : > { %1467 = vmatprep.subr.mxu1 %v2056_v36  ;;  %1494 = vmatprep.subr.mxu0 %v1969_v1 }
 0x16b   : > { %1468 = vmatpush3.msra.mxu1 %v2056_v36  ;;  %1495 = vmatpush3.msra.mxu0 %v1969_v1 }
 0x16c   : > { %1469 = vmatprep.subr.mxu1 %v2070_v45  ;;  %1496 = vmatprep.subr.mxu0 %v1981_v5 }
 0x16d   : > { %1470 = vmatpush3.msra.mxu1 %v2070_v45  ;;  %1497 = vmatpush3.msra.mxu0 %v1981_v5 }
 0x16e   : > { %1471 = vmatprep.subr.mxu1 %v2080_v50  ;;  %1498 = vmatprep.subr.mxu0 %v1995_v10 }
 0x16f   : > { %1472 = vmatpush3.msra.mxu1 %v2080_v50  ;;  %1499 = vmatpush3.msra.mxu0 %v1995_v10 }
 0x170   : > { %1473 = vmatprep.subr.mxu1 %v2097_v40  ;;  %1500 = vmatprep.subr.mxu0 %v2007_v15 }
 0x171   : > { %1474 = vmatpush3.msra.mxu1 %v2097_v40  ;;  %1501 = vmatpush3.msra.mxu0 %v2007_v15 }
 0x172   : > { %1475 = vmatprep.subr.mxu1 %v2113_v18  ;;  %1502 = vmatprep.subr.mxu0 %v2024_v21 }
 0x173   : > { %1476 = vmatpush3.msra.mxu1 %v2113_v18  ;;  %1503 = vmatpush3.msra.mxu0 %v2024_v21 }
 0x174   : > { %1477 = vmatprep.subr.mxu1 %v2124_v28  ;;  %1504 = vmatprep.subr.mxu0 %v2040_v27 }
 0x175   : > { %1478 = vmatpush3.msra.mxu1 %v2124_v28  ;;  %1479 = vmatprep.mubr.f32.mxu1 %v1921_v34 }
 0x176   : > { %1505 = vmatpush3.msra.mxu0 %v2040_v27  ;;  %1480 = vmatmul.mubr.f32.vlgmr.msra.gmra.mxu1 %v2084_v43 }
 0x177   : > { %1506 = vmatprep.subr.mxu0 %v2049_v31  ;;  %1517 = vmatprep.subr.mxu1 %v1976_v3 }
 0x178   : > { %1507 = vmatpush3.msra.mxu0 %v2049_v31  ;;  %1518 = vmatpush3.msra.mxu1 %v1976_v3 }
 0x179   : > { %1508 = vmatprep.subr.mxu0 %v2065_v46  ;;  %1519 = vmatprep.subr.mxu1 %v1963_v63 }
 0x17a   : > { %1509 = vmatpush3.msra.mxu0 %v2065_v46  ;;  %1520 = vmatpush3.msra.mxu1 %v1963_v63 }
 0x17b   : > { %1510 = vmatprep.subr.mxu0 %v2087_v52  ;;  %1521 = vmatprep.subr.mxu1 %v1990_v8 }
 0x17c   : > { %1511 = vmatpush3.msra.mxu0 %v2087_v52  ;;  %1522 = vmatpush3.msra.mxu1 %v1990_v8 }
 0x17d   : > { %1512 = vmatprep.subr.mxu0 %v2101_v7  ;;  %1523 = vmatprep.subr.mxu1 %v1993_v9 }
 0x17e   : > { %1513 = vmatpush3.msra.mxu0 %v2101_v7  ;;  %1514 = vmatprep.mubr.f32.mxu0 %v489_v35 }
 0x17f   : > { %1524 = vmatpush3.msra.mxu1 %v1993_v9  ;;  %1515 = vmatmul.mubr.f32.vlgmr.msra.gmra.mxu0 %v499_v38  ;;  %v236_v9 = vld [vmem:[%s2346_s3 + $0x8] sm:$0xff] }
 0x180   : > { %1525 = vmatprep.subr.mxu1 %v2005_v14  ;;  %1552 = vmatprep.subr.mxu0 %v1949_v57 }
 0x181   : > { %1526 = vmatpush3.msra.mxu1 %v2005_v14  ;;  %1553 = vmatpush3.msra.mxu0 %v1949_v57 }
 0x182   : > { %1527 = vmatprep.subr.mxu1 %v2017_v19  ;;  %1554 = vmatprep.subr.mxu0 %v1940_v51 }
 0x183   : > { %1528 = vmatpush3.msra.mxu1 %v2017_v19  ;;  %1555 = vmatpush3.msra.mxu0 %v1940_v51 }
 0x184   : > { %1529 = vmatprep.subr.mxu1 %v2030_v24  ;;  %1556 = vmatprep.subr.mxu0 %v1959_v62 }
 0x185   : > { %1530 = vmatpush3.msra.mxu1 %v2030_v24  ;;  %1557 = vmatpush3.msra.mxu0 %v1959_v62 }
 0x186   : > { %1531 = vmatprep.subr.mxu1 %v2046_v30  ;;  %1558 = vmatprep.subr.mxu0 %v1945_v54 }
 0x187   : > { %1532 = vmatpush3.msra.mxu1 %v2046_v30  ;;  %1559 = vmatpush3.msra.mxu0 %v1945_v54 }
 0x188   : > { %1533 = vmatprep.subr.mxu1 %v2062_v44  ;;  %1560 = vmatprep.subr.mxu0 %v1947_v56 }
 0x189   : > { %1534 = vmatpush3.msra.mxu1 %v2062_v44  ;;  %1561 = vmatpush3.msra.mxu0 %v1947_v56 }
 0x18a   : > { %1535 = vmatprep.subr.mxu1 %v2076_v49  ;;  %1562 = vmatprep.subr.mxu0 %v1951_v58 }
 0x18b   : > { %1536 = vmatpush3.msra.mxu1 %v2076_v49  ;;  %1563 = vmatpush3.msra.mxu0 %v1951_v58 }
 0x18c   : > { %1537 = vmatprep.subr.mxu1 %v2093_v6  ;;  %1564 = vmatprep.subr.mxu0 %v1969_v1 }
 0x18d   : > { %1538 = vmatpush3.msra.mxu1 %v2093_v6  ;;  %1565 = vmatpush3.msra.mxu0 %v1969_v1 }
 0x18e   : > { %1539 = vmatprep.subr.mxu1 %v2107_v17  ;;  %1566 = vmatprep.subr.mxu0 %v1981_v5 }
 0x18f   : > { %1540 = vmatpush3.msra.mxu1 %v2107_v17  ;;  %1567 = vmatpush3.msra.mxu0 %v1981_v5 }
 0x190   : > { %1541 = vmatprep.subr.mxu1 %v2119_v25  ;;  %1568 = vmatprep.subr.mxu0 %v1995_v10 }
 0x191   : > { %1542 = vmatpush3.msra.mxu1 %v2119_v25  ;;  %1569 = vmatpush3.msra.mxu0 %v1995_v10 }
 0x192   : > { %1543 = vmatprep.subr.mxu1 %v2130_v37  ;;  %1570 = vmatprep.subr.mxu0 %v2007_v15 }
 0x193   : > { %1544 = vmatpush3.msra.mxu1 %v2130_v37  ;;  %1571 = vmatpush3.msra.mxu0 %v2007_v15  ;;  %v235_v15 = vld [vmem:[%s2346_s3] sm:$0xff] }
 0x194   : > { %1545 = vmatprep.subr.mxu1 %v2140_v48  ;;  %1572 = vmatprep.subr.mxu0 %v2024_v21 }
 0x195   : > { %1546 = vmatpush3.msra.mxu1 %v2140_v48  ;;  %1573 = vmatpush3.msra.mxu0 %v2024_v21 }
 0x196   : > { %1547 = vmatprep.subr.mxu1 %v2147_v12  ;;  %1574 = vmatprep.subr.mxu0 %v2040_v27 }
 0x197   : > { %1548 = vmatpush3.msra.mxu1 %v2147_v12  ;;  %1549 = vmatprep.mubr.f32.mxu1 %v1918_v33 }
 0x198   : > { %1575 = vmatpush3.msra.mxu0 %v2040_v27  ;;  %1550 = vmatmul.mubr.f32.vlgmr.msra.gmra.mxu1 %v2052_v32 }
 0x199   : > { %1576 = vmatprep.subr.mxu0 %v2049_v31  ;;  %1584 = vmatprep.mubr.f32.mxu0 %v1918_v33 }
 0x19a   : > { %1577 = vmatpush3.msra.mxu0 %v2049_v31 }
 0x19b   : > { %1578 = vmatprep.subr.mxu0 %v2065_v46 }
 0x19c   : > { %1579 = vmatpush3.msra.mxu0 %v2065_v46 }
 0x19d   : > { %1580 = vmatprep.subr.mxu0 %v2087_v52 }
 0x19e   : > { %1581 = vmatpush3.msra.mxu0 %v2087_v52 }
 0x19f   : > { %1582 = vmatprep.subr.mxu0 %v2101_v7 }
 0x1a0   : > { %1583 = vmatpush3.msra.mxu0 %v2101_v7 }
 0x1a1   : > { %1585 = vmatmul.mubr.f32.vlgmr.msra.gmra.mxu0 %v2052_v32 }
 0x216   : > { %v1411_v34 = vpop.f32.mrf.mxu1 }
 0x218   : > { %v493_v35 = vpop.f32.mrf.mxu1 }
 0x21d   : > { %v1446_v51 = vpop.f32.mrf.mxu0 }
 0x21e   : > { %v661_v57 = vadd.f32 %v1446_v51, %v1411_v34 }
 0x21f   : > { %v654_v53 = vpop.f32.mrf.mxu0 }
 0x220   : > { %v655_v60 = vadd.f32 %v654_v53, %v493_v35 }
 0x236   : > { %v1481_v33 = vpop.f32.mrf.mxu1 }
 0x237   : > { %v772_v61 = vadd.f32 %v1481_v33, %v661_v57 }
 0x238   : > { %v764_v54 = vpop.f32.mrf.mxu1 }
 0x239   : > { %v765_v63 = vadd.f32 %v764_v54, %v655_v60 }
 0x23f   : > { %v1516_v56 = vpop.f32.mrf.mxu0 }
 0x240   : > { %v869_v0 = vadd.f32 %v1516_v56, %v772_v61 }
 0x241   : > { %v860_v62 = vpop.f32.mrf.mxu0 }
 0x242   : > { %v861_v2 = vadd.f32 %v860_v62, %v765_v63 }
 0x258   : > { %v1551_v58 = vpop.f32.mrf.mxu1 }
 0x259   : > { %v994_v3 = vadd.f32 %v1551_v58, %v869_v0 }
 0x25a   : > { %v987_v1 = vpop.f32.mrf.mxu1 }
 0x25b   : > { %v988_v5 = vadd.f32 %v987_v1, %v861_v2 }
 0x261   : > { %v1586_v4 = vpop.f32.mrf.mxu0 }
 0x262   : > { %v1087_v8 = vadd.f32 %v1586_v4, %v994_v3 }
 0x263   : > { %v1080_v10 = vpop.f32.mrf.mxu0 }
 0x264   : > { %v1215_v11 = vadd.f32 -0.6, %v1087_v8  ;;  %v1081_v14 = vadd.f32 %v1080_v10, %v988_v5 }
 0x266   : > { %v1093_v16 = vmul.f32 %v1215_v11, %v236_v9  ;;  %v1214_v19 = vadd.f32 -0.6, %v1081_v14 }
 0x268   : > { %v1092_v20 = vmul.f32 %v1214_v19, %v235_v15  ;;  %v1095_v21 = vmul.f32 %v1093_v16, %v1093_v16 }
 0x26a   : > { %v1094_v24 = vmul.f32 %v1092_v20, %v1092_v20  ;;  %v1100_v27 = vsel %vm1098_vm0, %v1095_v21, 0.0 }
 0x26c   : > { %v1099_v26 = vsel %vm1098_vm0, %v1094_v24, 0.0 }
 0x26d   : > { %v1101_v30 = vadd.f32 %v1100_v27, %v1099_v26 }
 0x26f   : > { %1102 = vadd.xlane.f32.xlu0 %v1101_v30 }
 0x2f8   : > { %v1103_v31 = vpop.xlane.xlu0 %1102 }
 0x2f9   : > { %v1104_v32 = vrot.slane %v1103_v31, 4 }
 0x2fb   : > { %v1105_v36 = vadd.f32 %v1104_v32, %v1103_v31 }
 0x2fd   : > { %v1106_v44 = vrot.slane %v1105_v36, 2 }
 0x2ff   : > { %v1107_v46 = vadd.f32 %v1106_v44, %v1105_v36 }
 0x301   : > { %v1108_v45 = vrot.slane %v1107_v46, 1 }
 0x303   : > { %v1109_v49 = vadd.f32 %v1108_v45, %v1107_v46 }
 0x305   : > { %1587 = vpush %v1109_v49 }
 0x336   : > { %s1588_s9 = spop %1587 }
 0x337   : > { %v1111_v50 = vstv %s1588_s9 }
 0x338   : > { %1112 = vst [vmem:[%s215_s5] sm:$0xff] %v1111_v50 }
 0x339   : > { %1686 = shalt.err (!%p1683_p10)
}
 0x33a   : > { %s1687_s23 = scalar_lea.hbm %s1125_s8, 128  ;;  %s1691_s26 = scalar_lea.hbm %s2347_s4, 256 }
 0x33b   : > { %p1688_p0 = scmp.ne.s32.totalorder %s1125_s8, %s1687_s23  ;;  %p1692_p1 = scmp.lt.s32.totalorder %s1125_s8, %s2347_s4 }
 0x33c   : > { %p1693_p3 = scmp.lt.s32.totalorder %s1691_s26, %s1687_s23 }
 0x33d   : > { %p1689_p2 = pnand %p1688_p0, %p2356_p12 }
 0x33e   : > { %p1694_p6 = por %p1693_p3, %p1692_p1 }
 0x33f   : > { %p1690_p9 = pneg %p1689_p2 }
 0x341   : > { %p1695_p11 = pnand %p1694_p6, %p1690_p9 }
 0x343   : > { %1698 = shalt.err (!%p1695_p11)
}
 0x344   : > { %1591 = dma.vmem_to_hbm [thread:$0]  (%p2356_p12), %s2303_s6, 128, %s1125_s8, %s1114_s10  }
 0x345 PF: > { %s1139_s5 = sand.u32 1, %s1725_s15   ;;  %p2357_p13 = scmp.ne.s32.totalorder %s2353_s28, 0 }
 0x346   : > { %p2358_p4 = scmp.ge.s32.totalorder %s1737_s18, 2  ;;  %s1140_s7 = scalar_lea.sflag [#allocation4], %s1139_s5 }
 0x348   : > { %p1598_p5 = pnand %p2358_p4, %p2357_p13 }
 0x34a   : > { %p1599_p7 = pneg %p1598_p5 }
 0x34c   : > { %1720 = dma.done.wait (%p1599_p7), %s1140_s7, 128  }
 0x34d   : > { %1722 = vsyncadd (%p1599_p7), %s1140_s7, 4294967168  ;;  %p17_p8 = scmp.ge.s32.totalorder %s1793_s21, 4   ;;  %s2359_s15 = smov %s1729_s16 }
 0x34e   : > { %s2360_s16 = smov %s1733_s17  ;;  %s2361_s17 = smov %s1805_s24 }
 0x34f   : > { %s2362_s18 = smov %s1793_s21  ;;  %19 = sbr.rel (!%p17_p8) target bundleno = 5 (0x5), region = 81 }
 0x354   :  { %1145 = vsyncpa [#allocation3], 1 }
 0x355   :  { %1147 = vsyncpa [#allocation3 + $0x1], 1 }
 0x356   :  { %1148 = vsyncpa [#allocation4], 1 }
 0x357   :  { %1150 = vsyncpa [#allocation4 + $0x1], 1 }

</bundles_post_ra>
